<compile_context>
chip_gen: v7x
topology: tpu7x:2x2x1
jax: 0.10.0
libtpu: 0.0.40
codegen_flags: <defaults>
</compile_context>

<pallas_src>
import functools

import jax
import jax.numpy as jnp
from jax import lax
from jax.experimental import pallas as pl
from jax.experimental.pallas import tpu as pltpu


def _round_up(x: int, m: int) -> int:
    return ((x + m - 1) // m) * m


def dqn_kernel(x_ref, w1_ref, b1_ref, w2_ref, b2_ref, o_ref):
    # x : (TB, S)   f32   batch tile of states
    # w1: (H, S)    bf16  encoder Linear weight, PyTorch (out, in) layout
    # b1: (1, H)    f32
    # w2: (Ap, H)   bf16  output_layer weight, zero-padded to Ap lanes
    # b2: (1, Ap)   f32   zero-padded
    # o : (TB, Ap)  f32   lane-dense output block
    x = x_ref[...].astype(jnp.bfloat16)

    # Encoder Linear: x @ w1^T  (contract the shared S axis; MXU, f32 acc).
    h = lax.dot_general(
        x, w1_ref[...],
        dimension_numbers=(((1,), (1,)), ((), ())),
        preferred_element_type=jnp.float32)
    h = jnp.maximum(h + b1_ref[...], 0.0)          # bias + ReLU in f32 (VPU)

    # Output Linear: h @ w2^T  (bf16 inputs, f32 accumulation).
    q = lax.dot_general(
        h.astype(jnp.bfloat16), w2_ref[...],
        dimension_numbers=(((1,), (1,)), ((), ())),
        preferred_element_type=jnp.float32)
    o_ref[...] = (q + b2_ref[...]).astype(o_ref.dtype)


@functools.partial(jax.jit, static_argnames=("block_b",))
def dqn_forward(x, w1, b1, w2, b2, *, block_b=256):
    """DQN forward: q = relu(x @ w1^T + b1) @ w2^T + b2.

    x: (B, S) f32; w1: (H, S); b1: (H,); w2: (A, H); b2: (A,)  ->  (B, A) f32.
    Weights/biases are in PyTorch nn.Linear (out, in) layout; no transposes.
    """
    B, S = x.shape
    H = w1.shape[0]
    A = w2.shape[0]

    # Batch tile: largest multiple of 8 up to `block_b` (fits VMEM easily for
    # these feature widths; shrink block_b first if H grows into the thousands,
    # especially on v7x's 64 MiB VMEM).
    TB = min(block_b, _round_up(B, 8))
    B_pad = pl.cdiv(B, TB) * TB
    # Lane-dense output: pad the action axis to a multiple of 128.
    A_pad = _round_up(A, 128)

    if B_pad != B:
        x = jnp.pad(x, ((0, B_pad - B), (0, 0)))

    # One-time layout/dtype prep (cheap glue): bf16 weights, zero-padded
    # phantom-action columns so they cannot leak into an argmax downstream.
    w1_b = w1.astype(jnp.bfloat16)                                    # (H, S)
    w2_b = jnp.pad(w2, ((0, A_pad - A), (0, 0))).astype(jnp.bfloat16)  # (Ap, H)
    b1_r = b1.reshape(1, H).astype(jnp.float32)
    b2_r = jnp.pad(b2, ((0, A_pad - A),)).reshape(1, A_pad).astype(jnp.float32)

    cost = pl.CostEstimate(
        flops=2 * B_pad * (S * H + H * A_pad),
        transcendentals=0,
        bytes_accessed=(x.size * 4 + w1_b.size * 2 + w2_b.size * 2
                        + b1_r.size * 4 + b2_r.size * 4 + B_pad * A_pad * 4),
    )

    q_pad = pl.pallas_call(
        dqn_kernel,
        out_shape=jax.ShapeDtypeStruct((B_pad, A_pad), jnp.float32),
        grid_spec=pltpu.PrefetchScalarGridSpec(
            num_scalar_prefetch=0,
            grid=(B_pad // TB,),
            in_specs=[
                pl.BlockSpec((TB, S), lambda i: (i, 0)),      # batch-tiled
                pl.BlockSpec((H, S), lambda i: (0, 0)),       # VMEM-resident
                pl.BlockSpec((1, H), lambda i: (0, 0)),
                pl.BlockSpec((A_pad, H), lambda i: (0, 0)),
                pl.BlockSpec((1, A_pad), lambda i: (0, 0)),
            ],
            out_specs=pl.BlockSpec((TB, A_pad), lambda i: (i, 0)),
        ),
        compiler_params=pltpu.CompilerParams(
            dimension_semantics=("parallel",)),   # megacore-shard the batch
        cost_estimate=cost,
    )(x, w1_b, b1_r, w2_b, b2_r)

    return q_pad[:B, :A]


if __name__ == "__main__":
    # Small shapes consistent with a vector-state DQN.
    B = 8           # batch
    S = 16          # state_dim (encoder input size)
    H = 32          # encoder hidden size => enc_out_size = prod((H,)) = 32
    A = 4           # action_size

    key = jax.random.PRNGKey(0)
    kx, k1, kb1, k2, kb2 = jax.random.split(key, 5)

    x = jax.random.normal(kx, (B, S), dtype=jnp.float32)

    # PyTorch-Linear-style init: U(-1/sqrt(fan_in), 1/sqrt(fan_in)).
    lim1 = 1.0 / jnp.sqrt(jnp.float32(S))
    w1 = jax.random.uniform(k1, (H, S), jnp.float32, -lim1, lim1)
    b1 = jax.random.uniform(kb1, (H,), jnp.float32, -lim1, lim1)
    lim2 = 1.0 / jnp.sqrt(jnp.float32(H))
    w2 = jax.random.uniform(k2, (A, H), jnp.float32, -lim2, lim2)
    b2 = jax.random.uniform(kb2, (A,), jnp.float32, -lim2, lim2)

    q = dqn_forward(x, w1, b1, w2, b2)
    jax.block_until_ready(q)
    assert q.shape == (B, A)

    # Tight check vs a bf16-quantized reference (matches kernel arithmetic).
    xq = x.astype(jnp.bfloat16).astype(jnp.float32)
    w1q = w1.astype(jnp.bfloat16).astype(jnp.float32)
    w2q = w2.astype(jnp.bfloat16).astype(jnp.float32)
    h_q = jnp.maximum(xq @ w1q.T + b1, 0.0)
    h_q = h_q.astype(jnp.bfloat16).astype(jnp.float32)
    q_bf16_ref = h_q @ w2q.T + b2
    assert jnp.allclose(q, q_bf16_ref, atol=1e-3, rtol=1e-3), \
        "mismatch vs bf16-quantized reference"

    # Loose sanity check vs the full-f32 PyTorch-semantics reference.
    h_ref = jnp.maximum(x @ w1.T + b1, 0.0)
    q_ref = h_ref @ w2.T + b2
    assert jnp.allclose(q, q_ref, atol=3e-2, rtol=3e-2), \
        "mismatch vs f32 reference"

    print("KERNEL_OK")
</pallas_src>

<mosaic_0001>
module attributes {stable_mosaic.version = 11 : i64} {
  func.func @dqn_kernel(%arg0: i32, %arg1: memref<8x16xf32, #tpu.memory_space<vmem>>, %arg2: memref<32x16xbf16, #tpu.memory_space<vmem>>, %arg3: memref<1x32xf32, #tpu.memory_space<vmem>>, %arg4: memref<128x32xbf16, #tpu.memory_space<vmem>>, %arg5: memref<1x128xf32, #tpu.memory_space<vmem>>, %arg6: memref<8x128xf32, #tpu.memory_space<vmem>>) attributes {dimension_semantics = [#tpu.dimension_semantics<parallel>], iteration_bounds = array<i64: 1>, scalar_prefetch = 0 : i64, scratch_operands = 0 : i64, tpu.core_type = #tpu.core_type<tc>, window_params = [{transform_indices = @transform_0, window_bounds = array<i64: 8, 16>}, {pipeline_mode = #tpu.pipeline_mode<synchronous>, transform_indices = @transform_1, window_bounds = array<i64: 32, 16>}, {pipeline_mode = #tpu.pipeline_mode<synchronous>, transform_indices = @transform_2, window_bounds = array<i64: 1, 32>}, {pipeline_mode = #tpu.pipeline_mode<synchronous>, transform_indices = @transform_3, window_bounds = array<i64: 128, 32>}, {pipeline_mode = #tpu.pipeline_mode<synchronous>, transform_indices = @transform_4, window_bounds = array<i64: 1, 128>}, {transform_indices = @transform_5, window_bounds = array<i64: 8, 128>}]} {
    %c0 = arith.constant 0 : index
    %c0_0 = arith.constant 0 : index
    %0 = vector.load %arg1[%c0, %c0_0] : memref<8x16xf32, #tpu.memory_space<vmem>>, vector<8x16xf32>
    %1 = arith.truncf %0 : vector<8x16xf32> to vector<8x16xbf16>
    %c0_1 = arith.constant 0 : index
    %c0_2 = arith.constant 0 : index
    %2 = vector.load %arg2[%c0_1, %c0_2] : memref<32x16xbf16, #tpu.memory_space<vmem>>, vector<32x16xbf16>
    %cst = arith.constant dense<0.000000e+00> : vector<8x32xf32>
    %3 = tpu.matmul %1, %2, %cst {dimension_numbers = #tpu.dot_dimension_numbers<[1], [1], [0], [0], [0, 0, 1, 0], [], []>} : vector<8x16xbf16>, vector<32x16xbf16>, vector<8x32xf32> -> vector<8x32xf32>
    %c0_3 = arith.constant 0 : index
    %c0_4 = arith.constant 0 : index
    %4 = vector.load %arg3[%c0_3, %c0_4] : memref<1x32xf32, #tpu.memory_space<vmem>>, vector<1x32xf32>
    %5 = vector.broadcast %4 : vector<1x32xf32> to vector<8x32xf32>
    %6 = arith.addf %3, %5 : vector<8x32xf32>
    %cst_5 = arith.constant 0.000000e+00 : f32
    %7 = vector.broadcast %cst_5 : f32 to vector<8x32xf32>
    %8 = arith.maximumf %6, %7 : vector<8x32xf32>
    %9 = arith.truncf %8 : vector<8x32xf32> to vector<8x32xbf16>
    %c0_6 = arith.constant 0 : index
    %c0_7 = arith.constant 0 : index
    %10 = vector.load %arg4[%c0_6, %c0_7] : memref<128x32xbf16, #tpu.memory_space<vmem>>, vector<128x32xbf16>
    %cst_8 = arith.constant dense<0.000000e+00> : vector<8x128xf32>
    %11 = tpu.matmul %9, %10, %cst_8 {dimension_numbers = #tpu.dot_dimension_numbers<[1], [1], [0], [0], [0, 0, 1, 0], [], []>} : vector<8x32xbf16>, vector<128x32xbf16>, vector<8x128xf32> -> vector<8x128xf32>
    %c0_9 = arith.constant 0 : index
    %c0_10 = arith.constant 0 : index
    %12 = vector.load %arg5[%c0_9, %c0_10] : memref<1x128xf32, #tpu.memory_space<vmem>>, vector<1x128xf32>
    %13 = vector.broadcast %12 : vector<1x128xf32> to vector<8x128xf32>
    %14 = arith.addf %11, %13 : vector<8x128xf32>
    %c0_11 = arith.constant 0 : index
    %c0_12 = arith.constant 0 : index
    %15 = vector.load %arg6[%c0_11, %c0_12] : memref<8x128xf32, #tpu.memory_space<vmem>>, vector<8x128xf32>
    tpu.vector_store %arg6[%c0_11, %c0_12], %14 {strides = array<i32>} : memref<8x128xf32, #tpu.memory_space<vmem>>, vector<8x128xf32>,
    return
  }
  func.func @transform_0(%arg0: i32) -> (i32, i32) {
    %c0_i32 = arith.constant 0 : i32
    %c0_i32_0 = arith.constant 0 : i32
    return %arg0, %c0_i32 : i32, i32
  }
  func.func @transform_1(%arg0: i32) -> (i32, i32) {
    %c0_i32 = arith.constant 0 : i32
    %c0_i32_0 = arith.constant 0 : i32
    %c0_i32_1 = arith.constant 0 : i32
    return %c0_i32, %c0_i32_0 : i32, i32
  }
  func.func @transform_2(%arg0: i32) -> (i32, i32) {
    %c0_i32 = arith.constant 0 : i32
    %c0_i32_0 = arith.constant 0 : i32
    %c0_i32_1 = arith.constant 0 : i32
    return %c0_i32, %c0_i32_0 : i32, i32
  }
  func.func @transform_3(%arg0: i32) -> (i32, i32) {
    %c0_i32 = arith.constant 0 : i32
    %c0_i32_0 = arith.constant 0 : i32
    %c0_i32_1 = arith.constant 0 : i32
    return %c0_i32, %c0_i32_0 : i32, i32
  }
  func.func @transform_4(%arg0: i32) -> (i32, i32) {
    %c0_i32 = arith.constant 0 : i32
    %c0_i32_0 = arith.constant 0 : i32
    %c0_i32_1 = arith.constant 0 : i32
    return %c0_i32, %c0_i32_0 : i32, i32
  }
  func.func @transform_5(%arg0: i32) -> (i32, i32) {
    %c0_i32 = arith.constant 0 : i32
    %c0_i32_0 = arith.constant 0 : i32
    return %arg0, %c0_i32 : i32, i32
  }
}

</mosaic_0001>

<bundles_post_ra>
// kernel: dqn_forward.1
= control target key start
LH: loop header
LB: loop body
LE: loop exit
PB: predicated region body
PF: predicated region fallthrough
CT: control target
= control target key end

     0   :  { %vm44_vm0 = vcmask 130048   ;;  %v298_v0 = vmov 0.0   ;;  %vm299_vm1 = vmmov 0   ;;  %vm159_vm2 = vcmask 261120   ;;  %s384_s1 = inlined_call_operand.vmem [shape: bf16[32,16], index: 1, kind: input, shape index: {}]   ;;  %s385_s3 = inlined_call_operand.vmem [shape: bf16[128,32], index: 3, kind: input, shape index: {}]   ;;  %s386_s0 = inlined_call_operand.vmem [shape: f32[8,16], index: 0, kind: input, shape index: {}]   ;;  %s387_s2 = inlined_call_operand.vmem [shape: f32[1,32], index: 2, kind: input, shape index: {}]   ;;  %s388_s4 = inlined_call_operand.vmem [shape: f32[1,128], index: 4, kind: input, shape index: {}]   ;;  %s389_s5 = inlined_call_operand.vmem [shape: f32[8,128], index: 5, kind: output, shape index: {}]  }
   0x1   :  { %258 = vmatprep.subr.bf16.mxu0 %v298_v0  ;;  %v288_v1 = vld [vmem:[%s384_s1] sm:$0xff]   ;;  %262 = vmatprep.mubr.msk.bf16.mxu0 %vm299_vm1, %v298_v0  ;;  %v289_v4 = vld [vmem:[%s384_s1 + $0x8] sm:$0xff]   ;;  %v292_v11 = vld [vmem:[%s385_s3 + $0x10] sm:$0xff]  }
   0x2   :  { %266 = vmatprep.subr.bf16.mxu1 %v298_v0  ;;  %282 = vmatprep.mubr.msk.bf16.mxu1 %vm299_vm1, %v298_v0  ;;  %v49_v2 = vsel %vm44_vm0, %v288_v1, 0  ;;  %v290_v3 = vld [vmem:[%s385_s3] sm:$0xff]   ;;  %v291_v6 = vld [vmem:[%s385_s3 + $0x8] sm:$0xff]   ;;  %v52_v7 = vsel %vm44_vm0, %v289_v4, 0  ;;  %v170_v12 = vsel %vm159_vm2, %v292_v11, 0  ;;  %v293_v13 = vld [vmem:[%s385_s3 + $0x18] sm:$0xff]  }
   0x3   :  { %259 = vmatpush3.bf16.xpose.msra.mxu0 %v49_v2  ;;  %v164_v5 = vsel %vm159_vm2, %v290_v3, 0  ;;  %v21_v8 = vld [vmem:[%s386_s0] sm:$0xff]  ;;  %v167_v9 = vsel %vm159_vm2, %v291_v6, 0  ;;  %v173_v14 = vsel %vm159_vm2, %v293_v13, 0  ;;  %v295_v17 = vld [vmem:[%s385_s3 + $0x28] sm:$0xff]   ;;  %v296_v19 = vld [vmem:[%s385_s3 + $0x30] sm:$0xff]  }
   0x4   :  { %260 = vmatprep.subr.bf16.mxu0 %v298_v0  ;;  %267 = vmatpush3.bf16.xpose.msra.mxu1 %v164_v5  ;;  %v22_v10 = vpack.c.bf16 %v21_v8, %v21_v8  ;;  %v294_v15 = vld [vmem:[%s385_s3 + $0x20] sm:$0xff]   ;;  %v179_v18 = vsel %vm159_vm2, %v295_v17, 0  ;;  %v182_v20 = vsel %vm159_vm2, %v296_v19, 0  ;;  %v297_v21 = vld [vmem:[%s385_s3 + $0x38] sm:$0xff]  }
   0x5   :  { %268 = vmatprep.subr.bf16.mxu1 %v298_v0  ;;  %v176_v16 = vsel %vm159_vm2, %v294_v15, 0  ;;  %v185_v22 = vsel %vm159_vm2, %v297_v21, 0  ;;  %v232_v23 = vld [vmem:[%s387_s2] ss:$0 sm:$0xff] }
   0x6   :  { %v236_v31 = vld [vmem:[%s388_s4] ss:$0 sm:$0xff] }
   0xb   :  { %261 = vmatpush3.bf16.xpose.msra.mxu0 %v52_v7 }
   0xc   :  { %269 = vmatpush3.bf16.xpose.msra.mxu1 %v167_v9 }
   0xd   :  { %270 = vmatprep.subr.bf16.mxu1 %v298_v0 }
  0x12   :  { %263 = vmatmul.mubr.msk.bf16.vlgmr.msra.gmra.mrb[0].mxu0 %vm44_vm0, %v22_v10 }
  0x14   :  { %271 = vmatpush3.bf16.xpose.msra.mxu1 %v170_v12 }
  0x15   :  { %272 = vmatprep.subr.bf16.mxu1 %v298_v0 }
  0x1c   :  { %273 = vmatpush3.bf16.xpose.msra.mxu1 %v173_v14 }
  0x1d   :  { %274 = vmatprep.subr.bf16.mxu1 %v298_v0 }
  0x24   :  { %275 = vmatpush3.bf16.xpose.msra.mxu1 %v176_v16 }
  0x25   :  { %276 = vmatprep.subr.bf16.mxu1 %v298_v0 }
  0x2c   :  { %277 = vmatpush3.bf16.xpose.msra.mxu1 %v179_v18 }
  0x2d   :  { %278 = vmatprep.subr.bf16.mxu1 %v298_v0 }
  0x34   :  { %279 = vmatpush3.bf16.xpose.msra.mxu1 %v182_v20 }
  0x35   :  { %280 = vmatprep.subr.bf16.mxu1 %v298_v0 }
  0x3c   :  { %281 = vmatpush3.bf16.xpose.msra.mxu1 %v185_v22 }
  0xe5   :  { %v88_v24 = vpop.f32.mrb[0].mxu0 }
  0xe6   :  { %v89_v25 = vadd.f32 %v232_v23, %v88_v24  ;;  %v264_v26 = vpop.f32.mrb[1].mxu0 }
  0xe7   :  { %v91_v27 = vpop.f32.mrb[2].mxu0 }
  0xe8   :  { %v94_v28 = vmax.f32 %v89_v25, 0.0  ;;  %v265_v29 = vpop.f32.mrb[3].mxu0 }
  0xea   :  { %v95_v30 = vpack.c.bf16 %v94_v28, %v94_v28 }
  0xec   :  { %283 = vmatmul.mubr.msk.bf16.vlgmr.msra.gmra.mrb[0].mxu1 %vm159_vm2, %v95_v30 }
 0x1bf   :  { %v221_v32 = vpop.f32.mrb[0].mxu1 }
 0x1c0   :  { %v222_v33 = vadd.f32 %v236_v31, %v221_v32  ;;  %v284_v34 = vpop.f32.mrb[1].mxu1 }
 0x1c1   :  { %v224_v35 = vpop.f32.mrb[2].mxu1 }
 0x1c2   :  { %227 = vst [vmem:[%s389_s5] sm:$0xff] %v222_v33  ;;  %v285_v36 = vpop.f32.mrb[3].mxu1 }

</bundles_post_ra>
